<compile_context>
chip_gen: v5e
topology: v5e:2x2
jax: 0.10.0
libtpu: 0.0.40
codegen_flags: <defaults>
</compile_context>

<pallas_src>
import jax
import jax.numpy as jnp
from jax.experimental import pallas as pl
from jax.experimental.pallas import tpu as pltpu


# ----------------------------------------------------------------------------
# One fused SpatialGraphConv layer:
#   per-edge message -> scatter-add aggregation -> relu(lin_out(aggr) + b)
# tiled over the output-channel axis (weight tile streamed from HBM in bf16).
# ----------------------------------------------------------------------------
def _geo_layer_kernel(rel_ref, win_ref, bin_ref, xj_ref, adj_ref,
                      wout_ref, bout_ref, out_ref):
    # lin_in has K = coors = 2: two VPU broadcast FMAs (no MXU push needed).
    rx = rel_ref[:, 0:1]                                  # [E, 1]
    ry = rel_ref[:, 1:2]                                  # [E, 1]
    scale = jnp.maximum(
        rx * win_ref[0:1, :] + ry * win_ref[1:2, :] + bin_ref[...], 0.0)  # [E, C_in]
    msg = scale * xj_ref[...]                             # [E, C_in] f32

    # Scatter-add over destinations as a dense one-hot matmul (tiny MXU push,
    # f32 accumulation). Recomputed per output tile: the recompute is hidden
    # under the multi-MiB weight DMA and keeps this grid axis "parallel".
    aggr = jnp.dot(adj_ref[...], msg,
                   preferred_element_type=jnp.float32)    # [N, C_in] f32

    # Output projection: bf16 LHS x bf16 weight tile, f32 accumulate, +b, relu.
    acc = jnp.dot(aggr.astype(jnp.bfloat16), wout_ref[0],
                  preferred_element_type=jnp.float32)     # [N, tn]
    out_ref[...] = jnp.maximum(acc + bout_ref[...], 0.0)


def geo_conv_layer(x_j, rel_pos, adj, win, b_in, wout_tiled, b_out):
    """relu(lin_out(sum_dst relu(lin_in(rel_pos)) * x_j) + b_out).

    x_j:        [E, C_in] f32   (pre-gathered source-node features)
    rel_pos:    [E, 2]    f32   (pos_j - pos_i)
    adj:        [N, E]    f32   (one-hot destination adjacency)
    win, b_in:  [2, C_in], [1, C_in] f32  (lin_in, transposed)
    wout_tiled: [n_tiles, C_in, tn] bf16  (lin_out, pre-tiled + contiguous)
    b_out:      [1, C_out] f32
    Returns [N, C_out] f32.
    """
    E, C_in = x_j.shape
    N = adj.shape[0]
    n_tiles, _, tn = wout_tiled.shape
    C_out = n_tiles * tn

    return pl.pallas_call(
        _geo_layer_kernel,
        out_shape=jax.ShapeDtypeStruct((N, C_out), jnp.float32),
        grid_spec=pltpu.PrefetchScalarGridSpec(
            num_scalar_prefetch=0,
            grid=(n_tiles,),
            in_specs=[
                pl.BlockSpec((E, 2), lambda j: (0, 0)),          # rel_pos (resident)
                pl.BlockSpec((2, C_in), lambda j: (0, 0)),       # lin_in weight
                pl.BlockSpec((1, C_in), lambda j: (0, 0)),       # lin_in bias
                pl.BlockSpec((E, C_in), lambda j: (0, 0)),       # x_j (resident)
                pl.BlockSpec((N, E), lambda j: (0, 0)),          # adjacency
                pl.BlockSpec((1, C_in, tn), lambda j: (j, 0, 0)),  # bf16 weight tile
                pl.BlockSpec((1, tn), lambda j: (0, j)),         # bias tile
            ],
            out_specs=pl.BlockSpec((N, tn), lambda j: (0, j)),
        ),
        compiler_params=pltpu.CompilerParams(
            dimension_semantics=("parallel",)),
    )(rel_pos, win, b_in, x_j, adj, wout_tiled, b_out)


# ----------------------------------------------------------------------------
# Full GNN_geoGCN forward: 3 fused layer calls + plain-JAX F.normalize.
# ----------------------------------------------------------------------------
def gnn_geogcn_forward(x, pos, edge_index, params):
    src = edge_index[0]          # j (source)
    dst = edge_index[1]          # i (target)
    rel_pos = (pos[src] - pos[dst]).astype(jnp.float32)    # pos_j - pos_i [E, 2]
    N = x.shape[0]
    # Dense one-hot adjacency so the scatter-add is a small MXU matmul.
    # TODO(synk): replace with scalar-prefetched dst indices + in-kernel
    # segment accumulation (and pad/batch N) before scaling to real graphs.
    adj = (dst[None, :] == jnp.arange(N)[:, None]).astype(jnp.float32)

    h = x
    for (win, b_in, wout_tiled, b_out) in params:
        x_j = h[src]                                        # gather glue (JAX)
        h = geo_conv_layer(x_j, rel_pos, adj, win, b_in, wout_tiled, b_out)

    # Trailing F.normalize(dim=1) on an 8x1024 array: plain JAX (XLA fuses it;
    # a dedicated pallas_call here is pure launch overhead, and single-tile
    # in-kernel fusion would idle one v7x TensorCore).
    norm = jnp.linalg.norm(h, axis=1, keepdims=True)
    return h / jnp.maximum(norm, 1e-12)


# ----------------------------------------------------------------------------
# Pure-JAX reference (same bf16 lin_out weights as the kernels).
# ----------------------------------------------------------------------------
def _ref_forward(x, pos, edge_index, params):
    src, dst = edge_index[0], edge_index[1]
    rel = (pos[src] - pos[dst]).astype(jnp.float32)
    N = x.shape[0]
    adj = (dst[None, :] == jnp.arange(N)[:, None]).astype(jnp.float32)
    h = x
    for (win, b_in, wout_tiled, b_out) in params:
        scale = jax.nn.relu(rel[:, 0:1] * win[0:1, :]
                            + rel[:, 1:2] * win[1:2, :] + b_in)
        msg = scale * h[src]
        aggr = jax.lax.dot(adj, msg, precision=jax.lax.Precision.HIGHEST)
        n_t, c_in, tn = wout_tiled.shape
        wout = wout_tiled.transpose(1, 0, 2).reshape(c_in, n_t * tn)
        h = jax.nn.relu(
            jnp.dot(aggr.astype(jnp.bfloat16), wout,
                    preferred_element_type=jnp.float32) + b_out)
    norm = jnp.linalg.norm(h, axis=1, keepdims=True)
    return h / jnp.maximum(norm, 1e-12)


# ----------------------------------------------------------------------------
# Parameter construction (lin_out pre-tiled in bf16 for contiguous HBM DMA).
# ----------------------------------------------------------------------------
def _init_linear(key, in_dim, out_dim, scale=0.05):
    kw, kb = jax.random.split(key)
    w_t = jax.random.normal(kw, (in_dim, out_dim), jnp.float32) * scale
    b = jax.random.normal(kb, (1, out_dim), jnp.float32) * scale
    return w_t, b


def make_params(key, num_node_features):
    coors = 2
    dims = [(num_node_features, 2048), (2048, 2048), (2048, 1024)]
    params = []
    for (c_in, c_out) in dims:
        key, k1, k2 = jax.random.split(key, 3)
        win, b_in = _init_linear(k1, coors, c_in)      # lin_in: coors -> C_in
        wout, b_out = _init_linear(k2, c_in, c_out)    # lin_out: C_in -> C_out
        # Pre-tile lin_out into [n_tiles, C_in, tn] bf16 (row-major => each
        # (C_in, tn) tile is contiguous in HBM). tn = C_out // 2 gives 2
        # "parallel" grid steps per layer (v7x 2-TC) with large lane-dense
        # tiles (~8 MiB double-buffered: fits v5e's 16 MiB scoped default).
        # TODO(synk): fp8 (v7x) / int8 (v5e/v6e) per-channel-scaled weights.
        tn = c_out // 2
        n_tiles = c_out // tn
        wout_tiled = (wout.astype(jnp.bfloat16)
                      .reshape(c_in, n_tiles, tn)
                      .transpose(1, 0, 2))             # [n_tiles, C_in, tn]
        params.append((win, b_in, wout_tiled, b_out))
    return params


if __name__ == "__main__":
    key = jax.random.PRNGKey(0)

    # Small, deterministic graph: 8 nodes on a ring, bidirectional edges (E=16).
    N = 8
    num_node_features = 16
    idx = jnp.arange(N)
    src = jnp.concatenate([idx, (idx + 1) % N])
    dst = jnp.concatenate([(idx + 1) % N, idx])
    edge_index = jnp.stack([src, dst]).astype(jnp.int32)   # [2, 16]

    kx, kp, kw = jax.random.split(key, 3)
    x = jax.random.normal(kx, (N, num_node_features), jnp.float32)
    pos = jax.random.normal(kp, (N, 2), jnp.float32)

    params = make_params(kw, num_node_features)

    out = gnn_geogcn_forward(x, pos, edge_index, params)
    out = jax.block_until_ready(out)

    ref = _ref_forward(x, pos, edge_index, params)
    assert out.shape == (N, 1024), out.shape
    assert jnp.allclose(out, ref, rtol=1e-2, atol=2e-3), \
        float(jnp.max(jnp.abs(out - ref)))

    print("KERNEL_OK")
</pallas_src>

<mosaic_0001>
module attributes {stable_mosaic.version = 11 : i64} {
  func.func @_geo_layer_kernel(%arg0: i32, %arg1: memref<16x2xf32, #tpu.memory_space<vmem>>, %arg2: memref<2x16xf32, #tpu.memory_space<vmem>>, %arg3: memref<1x16xf32, #tpu.memory_space<vmem>>, %arg4: memref<16x16xf32, #tpu.memory_space<vmem>>, %arg5: memref<8x16xf32, #tpu.memory_space<vmem>>, %arg6: memref<1x16x1024xbf16, #tpu.memory_space<vmem>>, %arg7: memref<1x1024xf32, #tpu.memory_space<vmem>>, %arg8: memref<8x1024xf32, #tpu.memory_space<vmem>>) attributes {dimension_semantics = [#tpu.dimension_semantics<parallel>], iteration_bounds = array<i64: 2>, scalar_prefetch = 0 : i64, scratch_operands = 0 : i64, tpu.core_type = #tpu.core_type<tc>, window_params = [{pipeline_mode = #tpu.pipeline_mode<synchronous>, transform_indices = @transform_0, window_bounds = array<i64: 16, 2>}, {pipeline_mode = #tpu.pipeline_mode<synchronous>, transform_indices = @transform_1, window_bounds = array<i64: 2, 16>}, {pipeline_mode = #tpu.pipeline_mode<synchronous>, transform_indices = @transform_2, window_bounds = array<i64: 1, 16>}, {pipeline_mode = #tpu.pipeline_mode<synchronous>, transform_indices = @transform_3, window_bounds = array<i64: 16, 16>}, {pipeline_mode = #tpu.pipeline_mode<synchronous>, transform_indices = @transform_4, window_bounds = array<i64: 8, 16>}, {transform_indices = @transform_5, window_bounds = array<i64: 1, 16, 1024>}, {transform_indices = @transform_6, window_bounds = array<i64: 1, 1024>}, {transform_indices = @transform_7, window_bounds = array<i64: 8, 1024>}]} {
    %c0 = arith.constant 0 : index
    %c0_0 = arith.constant 0 : index
    %0 = vector.load %arg1[%c0, %c0_0] : memref<16x2xf32, #tpu.memory_space<vmem>>, vector<16x1xf32>
    %c0_1 = arith.constant 0 : index
    %c1 = arith.constant 1 : index
    %1 = vector.load %arg1[%c0_1, %c1] : memref<16x2xf32, #tpu.memory_space<vmem>>, vector<16x1xf32>
    %c0_2 = arith.constant 0 : index
    %c0_3 = arith.constant 0 : index
    %2 = vector.load %arg2[%c0_2, %c0_3] : memref<2x16xf32, #tpu.memory_space<vmem>>, vector<1x16xf32>
    %3 = vector.broadcast %0 : vector<16x1xf32> to vector<16x16xf32>
    %4 = vector.broadcast %2 : vector<1x16xf32> to vector<16x16xf32>
    %5 = arith.mulf %3, %4 : vector<16x16xf32>
    %c1_4 = arith.constant 1 : index
    %c0_5 = arith.constant 0 : index
    %6 = vector.load %arg2[%c1_4, %c0_5] : memref<2x16xf32, #tpu.memory_space<vmem>>, vector<1x16xf32>
    %7 = vector.broadcast %1 : vector<16x1xf32> to vector<16x16xf32>
    %8 = vector.broadcast %6 : vector<1x16xf32> to vector<16x16xf32>
    %9 = arith.mulf %7, %8 : vector<16x16xf32>
    %10 = arith.addf %5, %9 : vector<16x16xf32>
    %c0_6 = arith.constant 0 : index
    %c0_7 = arith.constant 0 : index
    %11 = vector.load %arg3[%c0_6, %c0_7] : memref<1x16xf32, #tpu.memory_space<vmem>>, vector<1x16xf32>
    %12 = vector.broadcast %11 : vector<1x16xf32> to vector<16x16xf32>
    %13 = arith.addf %10, %12 : vector<16x16xf32>
    %cst = arith.constant 0.000000e+00 : f32
    %14 = vector.broadcast %cst : f32 to vector<16x16xf32>
    %15 = arith.maximumf %13, %14 : vector<16x16xf32>
    %c0_8 = arith.constant 0 : index
    %c0_9 = arith.constant 0 : index
    %16 = vector.load %arg4[%c0_8, %c0_9] : memref<16x16xf32, #tpu.memory_space<vmem>>, vector<16x16xf32>
    %17 = arith.mulf %15, %16 : vector<16x16xf32>
    %c0_10 = arith.constant 0 : index
    %c0_11 = arith.constant 0 : index
    %18 = vector.load %arg5[%c0_10, %c0_11] : memref<8x16xf32, #tpu.memory_space<vmem>>, vector<8x16xf32>
    %cst_12 = arith.constant dense<0.000000e+00> : vector<8x16xf32>
    %19 = tpu.matmul %18, %17, %cst_12 {dimension_numbers = #tpu.dot_dimension_numbers<[1], [0], [0], [1], [0, 0, 1, 1], [], []>} : vector<8x16xf32>, vector<16x16xf32>, vector<8x16xf32> -> vector<8x16xf32>
    %20 = arith.truncf %19 : vector<8x16xf32> to vector<8x16xbf16>
    %c0_13 = arith.constant 0 : index
    %c0_14 = arith.constant 0 : index
    %c0_15 = arith.constant 0 : index
    %21 = vector.load %arg6[%c0_13, %c0_14, %c0_15] : memref<1x16x1024xbf16, #tpu.memory_space<vmem>>, vector<1x16x1024xbf16>
    %22 = vector.shape_cast %21 : vector<1x16x1024xbf16> to vector<16x1024xbf16>
    %cst_16 = arith.constant dense<0.000000e+00> : vector<8x1024xf32>
    %23 = tpu.matmul %20, %22, %cst_16 {dimension_numbers = #tpu.dot_dimension_numbers<[1], [0], [0], [1], [0, 0, 1, 1], [], []>} : vector<8x16xbf16>, vector<16x1024xbf16>, vector<8x1024xf32> -> vector<8x1024xf32>
    %c0_17 = arith.constant 0 : index
    %c0_18 = arith.constant 0 : index
    %24 = vector.load %arg7[%c0_17, %c0_18] : memref<1x1024xf32, #tpu.memory_space<vmem>>, vector<1x1024xf32>
    %25 = vector.broadcast %24 : vector<1x1024xf32> to vector<8x1024xf32>
    %26 = arith.addf %23, %25 : vector<8x1024xf32>
    %cst_19 = arith.constant 0.000000e+00 : f32
    %27 = vector.broadcast %cst_19 : f32 to vector<8x1024xf32>
    %28 = arith.maximumf %26, %27 : vector<8x1024xf32>
    %c0_20 = arith.constant 0 : index
    %c0_21 = arith.constant 0 : index
    %29 = vector.load %arg8[%c0_20, %c0_21] : memref<8x1024xf32, #tpu.memory_space<vmem>>, vector<8x1024xf32>
    tpu.vector_store %arg8[%c0_20, %c0_21], %28 {strides = array<i32>} : memref<8x1024xf32, #tpu.memory_space<vmem>>, vector<8x1024xf32>,
    return
  }
  func.func @transform_0(%arg0: i32) -> (i32, i32) {
    %c0_i32 = arith.constant 0 : i32
    %c0_i32_0 = arith.constant 0 : i32
    %c0_i32_1 = arith.constant 0 : i32
    return %c0_i32, %c0_i32_0 : i32, i32
  }
  func.func @transform_1(%arg0: i32) -> (i32, i32) {
    %c0_i32 = arith.constant 0 : i32
    %c0_i32_0 = arith.constant 0 : i32
    %c0_i32_1 = arith.constant 0 : i32
    return %c0_i32, %c0_i32_0 : i32, i32
  }
  func.func @transform_2(%arg0: i32) -> (i32, i32) {
    %c0_i32 = arith.constant 0 : i32
    %c0_i32_0 = arith.constant 0 : i32
    %c0_i32_1 = arith.constant 0 : i32
    return %c0_i32, %c0_i32_0 : i32, i32
  }
  func.func @transform_3(%arg0: i32) -> (i32, i32) {
    %c0_i32 = arith.constant 0 : i32
    %c0_i32_0 = arith.constant 0 : i32
    %c0_i32_1 = arith.constant 0 : i32
    return %c0_i32, %c0_i32_0 : i32, i32
  }
  func.func @transform_4(%arg0: i32) -> (i32, i32) {
    %c0_i32 = arith.constant 0 : i32
    %c0_i32_0 = arith.constant 0 : i32
    %c0_i32_1 = arith.constant 0 : i32
    return %c0_i32, %c0_i32_0 : i32, i32
  }
  func.func @transform_5(%arg0: i32) -> (i32, i32, i32) {
    %c0_i32 = arith.constant 0 : i32
    %c0_i32_0 = arith.constant 0 : i32
    %c0_i32_1 = arith.constant 0 : i32
    return %arg0, %c0_i32, %c0_i32_0 : i32, i32, i32
  }
  func.func @transform_6(%arg0: i32) -> (i32, i32) {
    %c0_i32 = arith.constant 0 : i32
    %c0_i32_0 = arith.constant 0 : i32
    return %c0_i32, %arg0 : i32, i32
  }
  func.func @transform_7(%arg0: i32) -> (i32, i32) {
    %c0_i32 = arith.constant 0 : i32
    %c0_i32_0 = arith.constant 0 : i32
    return %c0_i32, %arg0 : i32, i32
  }
}

</mosaic_0001>

<bundles_post_ra>
// kernel: tpu_custom_call.1
= control target key start
LH: loop header
LB: loop body
LE: loop exit
PB: predicated region body
PF: predicated region fallthrough
CT: control target
= control target key end

     0   :  { %s1314_s0 = inlined_call_operand.vmem [shape: f32[16,2], index: 0, kind: input, shape index: {}]   ;;  %s1315_s1 = inlined_call_operand.vmem [shape: f32[2,16], index: 1, kind: input, shape index: {}]   ;;  %s1316_s2 = inlined_call_operand.vmem [shape: f32[1,16], index: 2, kind: input, shape index: {}]   ;;  %s1317_s3 = inlined_call_operand.vmem [shape: f32[16,16], index: 3, kind: input, shape index: {}]   ;;  %s1318_s4 = inlined_call_operand.hbm [shape: f32[8,16], index: 4, kind: input, shape index: {}]   ;;  %s1319_s5 = inlined_call_operand.hbm [shape: bf16[2,16,1024], index: 5, kind: input, shape index: {}]   ;;  %s1320_s6 = inlined_call_operand.hbm [shape: f32[1,2048], index: 6, kind: input, shape index: {}]   ;;  %s1321_s7 = inlined_call_operand.hbm [shape: f32[8,2048], index: 7, kind: output, shape index: {}]  }
   0x1   :  { %1325 = sst [smem:[#allocation15_spill]] %s1318_s4 }
   0x2   :  { %1326 = sst [smem:[#allocation16_spill]] %s1319_s5 }
   0x3   :  { %12 = vsyncpa [#allocation3], 0 }
   0x4   :  { %13 = vsyncpa [#allocation6], 0 }
   0x5   :  { %15 = vsyncpa [#allocation6 + $0x1], 0 }
   0x6   :  { %16 = vsyncpa [#allocation4], 0 }
   0x7   :  { %18 = vsyncpa [#allocation4 + $0x1], 0  ;;  %s1079_s24 = smov 0   ;;  %s1081_s25 = smov 0  }
   0x8   :  { %s1083_s26 = smov 0   ;;  %s1085_s27 = smov 0  }
   0x9 LB: > { %1327 = sst [smem:[#allocation12_spill]] %s1028_s26  ;;  %s1100_s28 = sadd.s32 1, %s1032_s27   ;;  %s1032_s27 = sphi %s1085_s27, %s1338_s27   ;;  %s1028_s26 = sphi %s1083_s26, %s1340_s26   ;;  %s1024_s25 = sphi %s1081_s25, %s1342_s25   ;;  %s1020_s24 = sphi %s1079_s24, %s1341_s24  }
   0xa   : > { %1328 = sst [smem:[#allocation13_spill]] %s1100_s28  ;;  %s136_s29 = sadd.s32 1, %s1028_s26 }
   0xb   : > { %s133_s30 = ssub.s32 %s1032_s27, %s1100_s28  ;;  %p143_p0 = scmp.ne.s32.totalorder %s1028_s26, %s1024_s25 }
   0xc   : > { %p134_p1 = scmp.eq.s32.totalorder %s133_s30, 0  ;;  %p144_p2 = scmp.eq.s32.totalorder %s1032_s27, 0 }
   0xd   : > { %p825_p4 = scmp.lt.s32.totalorder %s1032_s27, 2  ;;  %s249_s9 = sand.u32 1, %s1032_s27  }
   0xe   : > { %s1111_s8 = scalar_select %p134_p1, %s1028_s26, %s136_s29  }
   0xf   : > { %p145_p5 = por %p144_p2, %p143_p0  ;;  %s251_s10 = sand.u32 1, %s1028_s26  }
  0x10   : > { %1329 = sst [smem:[#allocation14_spill]] %s1111_s8  ;;  %s733_s11 = sshll.u32 %s251_s10, 6 }
  0x11   : > { %s789_s12 = sshll.u32 %s1032_s27, 6  ;;  %s1330_s5 = sld [smem:[#allocation16_spill]] }
  0x12   : > { %s253_s17 = scalar_lea.vmem [#allocation5], %s733_s11  ;;  %p1126_p6 = pnand %p825_p4, %p145_p5 }
  0x13   : > { %s261_s18 = sshll.u32 %s253_s17, 4  ;;  %s1130_s20 = scalar_lea.sflag [#allocation6], %s249_s9  ;;  %s262_s18 = int_to_ptr.vmem [resolvable:$true] %s261_s18 }
  0x14   : > { %p876_p8 = pneg %p1126_p6 }
  0x17   : > { %s258_s15 = scalar_lea.hbm %s1330_s5, %s789_s12  ;;  %s879_s30 = scalar_lea.hbm %s1330_s5, 128 }
  0x18   : > { %s259_s16 = sshll.u32 %s258_s15, 4  ;;  %s260_s16 = int_to_ptr.hbm [resolvable:$true] %s259_s16 }
  0x19   : > { %s872_s21 = sshra.s32 %s260_s16, 4  ;;  %s873_s21 = int_to_ptr.hbm [resolvable:$true] %s872_s21 }
  0x1a   : > { %s874_s22 = scalar_lea.hbm %s873_s21, 64  ;;  %p880_p11 = scmp.lt.s32.totalorder %s873_s21, %s1330_s5 }
  0x1b   : > { %p875_p7 = scmp.ne.s32.totalorder %s873_s21, %s874_s22  ;;  %p881_p12 = scmp.lt.s32.totalorder %s879_s30, %s874_s22 }
  0x1d   : > { %p877_p9 = pnand %p876_p8, %p875_p7  ;;  %p882_p13 = por %p881_p12, %p880_p11 }
  0x1f   : > { %p878_p10 = pneg %p877_p9 }
  0x21   : > { %p883_p1 = pnand %p882_p13, %p878_p10 }
  0x23   : > { %886 = shalt.err (!%p883_p1)
}
  0x24   : > { %s1034_s9 = smov 512   ;;  %s1035_s13 = smov 32  }
  0x25   : > { %816 = dma.hbm_to_vmem [thread:$0]  (!%p1126_p6), %s260_s16, 1024, %s262_s18, %s1130_s20, %s1034_s9, %s1034_s9, %s1035_s13  }
  0x26   : > { %s1147_s14 = sadd.s32 4294967295, %s1032_s27   ;;  %s729_s15 = sadd.s32 4294967294, %s1032_s27  }
  0x27   : > { %p149_p2 = scmp.ne.s32.totalorder %s1024_s25, %s1020_s24  ;;  %p150_p4 = scmp.eq.s32.totalorder %s1147_s14, 0 }
  0x28   : > { %p199_p5 = scmp.eq.s32.totalorder %s1147_s14, 1  ;;  %p205_p7 = scmp.eq.s32.totalorder %s729_s15, 1 }
  0x29   : > { %p1156_p9 = por %p150_p4, %p149_p2  ;;  %p730_p10 = scmp.ge.s32.totalorder %s1032_s27, 1 }
  0x2a   : > { %p1164_p11 = por %p199_p5, %p143_p0  ;;  %p1168_p12 = por %p205_p7, %p149_p2 }
  0x2b   : > { %p212_p13 = scmp.lt.s32.totalorder %s1032_s27, 3  ;;  %s1335_s4 = sld [smem:[#allocation15_spill]] }
  0x2c   : > { %s1036_s30 = smov [#allocation2]   ;;  %s736_s12 = sshll.u32 %s251_s10, 3 }
  0x2d   : > { %p1176_p1 = pnand %p730_p10, %p212_p13  ;;  %s238_s11 = sshll.u32 %s1036_s30, 4  ;;  %s239_s11 = int_to_ptr.vmem [resolvable:$true] %s238_s11 }
  0x2e   : > { %s737_s9 = sshll.u32 %s1032_s27, 3  ;;  %s939_s28 = scalar_lea.hbm %s1320_s6, 16 }
  0x2f   : > { %p809_p0 = pneg %p1176_p1  ;;  %s279_s21 = scalar_lea.hbm %s1320_s6, %s737_s9 }
  0x30   : > { %s281_s22 = sshll.u32 %s279_s21, 4  ;;  %s282_s22 = int_to_ptr.hbm [resolvable:$true] %s281_s22 }
  0x31   : > { %s236_s23 = sshll.u32 %s1335_s4, 4  ;;  %p810_p2 = pnand %p809_p0, %p150_p4  ;;  %s237_s23 = int_to_ptr.hbm [resolvable:$true] %s236_s23 }
  0x32   : > { %s275_s4 = scalar_lea.vmem [#allocation7], %s736_s12  ;;  %s932_s30 = sshra.s32 %s282_s22, 4  ;;  %s933_s30 = int_to_ptr.hbm [resolvable:$true] %s932_s30 }
  0x33   : > { %s283_s5 = sshll.u32 %s275_s4, 4  ;;  %s934_s10 = scalar_lea.hbm %s933_s30, 8  ;;  %s284_s5 = int_to_ptr.vmem [resolvable:$true] %s283_s5 }
  0x34   : > { %812 = dma.hbm_to_vmem [thread:$0]  (!%p810_p2), %s237_s23, 128, %s239_s11, [#allocation3]  }
  0x35   : > { %p935_p5 = scmp.ne.s32.totalorder %s933_s30, %s934_s10  ;;  %p940_p13 = scmp.lt.s32.totalorder %s933_s30, %s1320_s6 }
  0x36   : > { %p941_p0 = scmp.lt.s32.totalorder %s939_s28, %s934_s10 }
  0x37   : > { %p937_p7 = pnand %p935_p5, %p876_p8 }
  0x38   : > { %p942_p3 = por %p941_p0, %p940_p13 }
  0x39   : > { %p938_p10 = pneg %p937_p7 }
  0x3b   : > { %p943_p2 = pnand %p942_p3, %p938_p10 }
  0x3d   : > { %946 = shalt.err (!%p943_p2)
}
  0x3e   : > { %819 = dma.hbm_to_vmem [thread:$0]  (!%p1126_p6), %s282_s22, 128, %s284_s5, %s1130_s20  }
  0x3f   : > { %292 = sbr.rel (%p1176_p1) target bundleno = 497 (0x1f1), region = 48 }
  0x44   : > { %1007 = dma.done.wait (%p150_p4), [#allocation3], 128  }
  0x45   : > { %1009 = vsyncadd (%p150_p4), [#allocation3], 4294967168  ;;  %s299_s4 = sand.u32 1, %s1147_s14   ;;  %s1210_s26 = sand.u32 1, %s1024_s25  }
  0x46   : > { %s740_s28 = sshll.u32 %s1210_s26, 6  ;;  %s300_s8 = scalar_lea.sflag [#allocation6], %s299_s4 }
  0x47   : > { %s1215_s5 = scalar_lea.vmem [#allocation5], %s740_s28 }
  0x48   : > { %1011 = dma.done.wait (%p1156_p9), %s300_s8, 1152  }
  0x49   : > { %1013 = vsyncadd (%p1156_p9), %s300_s8, 4294966144  ;;  %v1037_v0 = vmov 0   ;;  %v354_v1 = vld [vmem:[%s1314_s0 + $0x8] sm:$0xff]  ;;  %v353_v2 = vld [vmem:[%s1314_s0] sm:$0xff]  ;;  %v1038_v3 = vmov 1   ;;  %vm396_vm0 = vcmask 130048  }
  0x4a   : > { %867 = vset.pattern.permute.xlu1 %v1037_v0  ;;  %865 = vset.pattern.permute.xlu0 %v1037_v0  ;;  %v869_v6 = vld [vmem:[%s1315_s1] ss:$0 sm:$0xff]  ;;  %v870_v7 = vld [vmem:[%s1315_s1 + $0x1] ss:$0 sm:$0xff]  ;;  %v392_v19 = vld [vmem:[%s1317_s3 + $0x8] sm:$0xff]  ;;  %s741_s4 = sshll.u32 %s1210_s26, 3 }
  0x4b   : > { %363 = vperm.xlu0 %865, %v354_v1   ;;  %358 = vperm.xlu1 %867, %v353_v2   ;;  %v871_v14 = vld [vmem:[%s1316_s2] ss:$0 sm:$0xff]  ;;  %v746_v26 = vld [vmem:[%s1215_s5] sm:$0xf]  ;;  %v790_v28 = vld [vmem:[%s1215_s5 + $0x4] sm:$0xf] }
  0x4c   : > { %v391_v22 = vld [vmem:[%s1317_s3] sm:$0xff]  ;;  %v794_v27 = vld [vmem:[%s1215_s5 + $0x1c] sm:$0xf0]  ;;  %v748_v30 = vld [vmem:[%s1215_s5 + $0x20] sm:$0xf0]  ;;  %s313_s8 = scalar_lea.vmem [#allocation7], %s741_s4 }
  0x4d   : > { %v395_v25 = vld [vmem:[#allocation2] sm:$0xff]  ;;  %v747_v29 = vor.u32 %v794_v27, %v746_v26  ;;  %v754_v31 = vld [vmem:[%s1215_s5 + $0x8] sm:$0xf]  ;;  %v751_v33 = vor.u32 %v790_v28, %v748_v30  ;;  %v791_v35 = vld [vmem:[%s1215_s5 + $0xc] sm:$0xf]  ;;  %s611_s17 = scalar_lea.sflag [#allocation4], %s1210_s26 }
  0x4e   : > { %v795_v32 = vld [vmem:[%s1215_s5 + $0x24] sm:$0xf0]  ;;  %v756_v36 = vld [vmem:[%s1215_s5 + $0x28] sm:$0xf0]  ;;  %v792_v38 = vld [vmem:[%s1215_s5 + $0x14] sm:$0xf] }
  0x4f   : > { %v755_v34 = vor.u32 %v795_v32, %v754_v31  ;;  %497 = vmatpush.bf16.msra.mxu1 %v747_v29  ;;  %v759_v37 = vor.u32 %v791_v35, %v756_v36  ;;  %510 = vmatpush.bf16.msra.mxu2 %v751_v33  ;;  %v764_v39 = vld [vmem:[%s1215_s5 + $0x30] sm:$0xf0]  ;;  %v770_v40 = vld [vmem:[%s1215_s5 + $0x18] sm:$0xf]  ;;  %v762_v43 = vld [vmem:[%s1215_s5 + $0x10] sm:$0xf] }
  0x50   : > { %v767_v41 = vor.u32 %v792_v38, %v764_v39  ;;  %v797_v42 = vld [vmem:[%s1215_s5 + $0x34] sm:$0xf0]  ;;  %v796_v44 = vld [vmem:[%s1215_s5 + $0x2c] sm:$0xf0]  ;;  %v793_v47 = vld [vmem:[%s1215_s5 + $0x1c] sm:$0xf] }
  0x51   : > { %523 = vmatpush.bf16.msra.mxu3 %v755_v34  ;;  %v771_v45 = vor.u32 %v797_v42, %v770_v40  ;;  %v763_v46 = vor.u32 %v796_v44, %v762_v43  ;;  %v772_v48 = vld [vmem:[%s1215_s5 + $0x38] sm:$0xf0]  ;;  %v429_v52 = vld [vmem:[%s313_s8] sm:$0xff]  ;;  %s1270_s5 = scalar_lea.vmem [#allocation8], %s740_s28  ;;  %s798_s28 = sshll.u32 %s1147_s14, 6 }
  0x52   : > { %v775_v49 = vor.u32 %v793_v47, %v772_v48  ;;  %v431_v53 = vperm.slane %v429_v52, 0  ;;  %v434_v54 = vperm.slane %v429_v52, 3  ;;  %v432_v60 = vperm.slane %v429_v52, 1  ;;  %s622_s23 = scalar_lea.hbm %s1321_s7, %s798_s28  ;;  %s624_s29 = sshll.u32 %s1270_s5, 4  ;;  %s625_s29 = int_to_ptr.vmem [resolvable:$true] %s624_s29 }
  0x53   : > { %866 = vset.pattern.permute.xlu0 %v1038_v3  ;;  %868 = vset.pattern.permute.xlu1 %v1038_v3  ;;  %v433_v62 = vperm.slane %v429_v52, 2  ;;  %s626_s14 = sshll.u32 %s622_s23, 4  ;;  %s982_s22 = scalar_lea.hbm %s1321_s7, 128  ;;  %s627_s14 = int_to_ptr.hbm [resolvable:$true] %s626_s14 }
  0x54   : > { %375 = vperm.xlu0 %866, %v354_v1   ;;  %371 = vperm.xlu1 %868, %v353_v2   ;;  %s976_s11 = sshra.s32 %s627_s14, 4  ;;  %s977_s11 = int_to_ptr.hbm [resolvable:$true] %s976_s11 }
  0x55   : > { %562 = vmatpush.bf16.msrb.mxu2 %v767_v41  ;;  %575 = vmatpush.bf16.msrb.mxu3 %v771_v45  ;;  %s978_s12 = scalar_lea.hbm %s977_s11, 64  ;;  %p983_p4 = scmp.lt.s32.totalorder %s977_s11, %s1321_s7 }
  0x56   : > { %549 = vmatpush.bf16.msrb.mxu1 %v763_v46  ;;  %p979_p3 = scmp.ne.s32.totalorder %s977_s11, %s978_s12  ;;  %p984_p9 = scmp.lt.s32.totalorder %s982_s22, %s978_s12 }
  0x58   : > { %p980_p6 = pnand %p979_p3, %p1164_p11  ;;  %p985_p1 = por %p984_p9, %p983_p4 }
  0x5a   : > { %p981_p8 = pneg %p980_p6 }
  0x5c   : > { %p986_p5 = pnand %p985_p1, %p981_p8 }
  0xbd   : > { %v364_v4 = vpop.permute.xlu0 %363  ;;  %v359_v5 = vpop.permute.xlu1 %358 }
  0xbe   : > { %v368_v10 = vmul.f32 %v869_v6, %v364_v4  ;;  %v367_v11 = vmul.f32 %v869_v6, %v359_v5 }
  0xc6   : > { %v376_v8 = vpop.permute.xlu0 %375  ;;  %v372_v9 = vpop.permute.xlu1 %371 }
  0xc7   : > { %v380_v12 = vmul.f32 %v870_v7, %v376_v8  ;;  %v379_v13 = vmul.f32 %v870_v7, %v372_v9  ;;  %v435_v7 = vperm.slane %v429_v52, 4  ;;  %v438_v9 = vperm.slane %v429_v52, 7 }
  0xc9   : > { %v382_v15 = vadd.f32 %v380_v12, %v368_v10  ;;  %v381_v16 = vadd.f32 %v379_v13, %v367_v11 }
  0xcb   : > { %v388_v17 = vadd.f32 %v871_v14, %v382_v15  ;;  %v387_v18 = vadd.f32 %v871_v14, %v381_v16  ;;  %v436_v16 = vperm.slane %v429_v52, 5 }
  0xcd   : > { %v390_v20 = vmax.f32 %v388_v17, 0.0  ;;  %v389_v21 = vmax.f32 %v387_v18, 0.0  ;;  %v437_v18 = vperm.slane %v429_v52, 6 }
  0xcf   : > { %v394_v23 = vmul.f32 %v392_v19, %v390_v20  ;;  %v393_v24 = vmul.f32 %v391_v22, %v389_v21 }
  0xd1   : > { %414 = vmatpush.msra.mxu0 %v394_v23 }
  0xd3   : > { %415 = vmatpush.msra.mxu0 %v393_v24 }
  0xd4   : > { %743 = vmatmul.msk.f32.vlgmr.msra.gmra.mxu0 %vm396_vm0, %v395_v25 }
  0xd5   : > { %536 = vmatpush.bf16.msrb.mxu0 %v759_v37 }
  0xd9   : > { %588 = vmatpush.bf16.msra.mxu0 %v775_v49 }
 0x151   : > { %v417_v50 = vpop.f32.mrf.mxu0 }
 0x152   : > { %v420_v51 = vpack.c.bf16 %v417_v50, %v417_v50 }
 0x154   : > { %776 = vmatmul.msk.bf16.vlgmr.msra.gmra.mxu1 %vm396_vm0, %v420_v51  ;;  %777 = vmatmul.msk.bf16.vlgmr.msra.gmra.mxu2 %vm396_vm0, %v420_v51 }
 0x155   : > { %778 = vmatmul.msk.bf16.vlgmr.msra.gmra.mxu3 %vm396_vm0, %v420_v51  ;;  %779 = vmatmul.msk.bf16.vlgmr.msrb.gmra.mxu0 %vm396_vm0, %v420_v51 }
 0x164   : > { %780 = vmatmul.msk.bf16.vlgmr.msrb.gmra.mxu1 %vm396_vm0, %v420_v51  ;;  %781 = vmatmul.msk.bf16.vlgmr.msrb.gmra.mxu2 %vm396_vm0, %v420_v51 }
 0x165   : > { %782 = vmatmul.msk.bf16.vlgmr.msrb.gmra.mxu3 %vm396_vm0, %v420_v51  ;;  %783 = vmatmul.msk.bf16.vlgmr.msra.gmra.mxu0 %vm396_vm0, %v420_v51 }
 0x1d1   : > { %v499_v55 = vpop.f32.mrf.mxu1 }
 0x1d2   : > { %v500_v56 = vadd.f32 %v499_v55, %v431_v53  ;;  %v538_v57 = vpop.f32.mrf.mxu0 }
 0x1d3   : > { %v539_v58 = vadd.f32 %v538_v57, %v434_v54 }
 0x1d4   : > { %v594_v59 = vmax.f32 %v500_v56, 0.0 }
 0x1d5   : > { %v597_v61 = vmax.f32 %v539_v58, 0.0 }
 0x1d6   : > { %602 = vst [vmem:[%s1270_s5] sm:$0xff] %v594_v59 }
 0x1d7   : > { %605 = vst [vmem:[%s1270_s5 + $0x18] sm:$0xff] %v597_v61  ;;  %v512_v63 = vpop.f32.mrf.mxu2 }
 0x1d8   : > { %v513_v0 = vadd.f32 %v512_v63, %v432_v60  ;;  %v525_v1 = vpop.f32.mrf.mxu3 }
 0x1d9   : > { %v526_v2 = vadd.f32 %v525_v1, %v433_v62  ;;  %v501_v3 = vpop.f32.mrf.mxu1 }
 0x1da   : > { %v595_v4 = vmax.f32 %v513_v0, 0.0  ;;  %v540_v5 = vpop.f32.mrf.mxu0 }
 0x1db   : > { %v596_v6 = vmax.f32 %v526_v2, 0.0 }
 0x1dc   : > { %603 = vst [vmem:[%s1270_s5 + $0x8] sm:$0xff] %v595_v4 }
 0x1dd   : > { %604 = vst [vmem:[%s1270_s5 + $0x10] sm:$0xff] %v596_v6 }
 0x1df   : > { %v514_v8 = vpop.f32.mrf.mxu2 }
 0x1e0   : > { %v527_v10 = vpop.f32.mrf.mxu3 }
 0x1e1   : > { %v551_v11 = vpop.f32.mrf.mxu1 }
 0x1e2   : > { %v552_v12 = vadd.f32 %v551_v11, %v435_v7  ;;  %v590_v13 = vpop.f32.mrf.mxu0 }
 0x1e3   : > { %v591_v14 = vadd.f32 %v590_v13, %v438_v9 }
 0x1e4   : > { %v598_v15 = vmax.f32 %v552_v12, 0.0 }
 0x1e5   : > { %v601_v17 = vmax.f32 %v591_v14, 0.0 }
 0x1e6   : > { %606 = vst [vmem:[%s1270_s5 + $0x20] sm:$0xff] %v598_v15 }
 0x1e7   : > { %609 = vst [vmem:[%s1270_s5 + $0x38] sm:$0xff] %v601_v17  ;;  %v564_v19 = vpop.f32.mrf.mxu2 }
 0x1e8   : > { %v565_v20 = vadd.f32 %v564_v19, %v436_v16  ;;  %v577_v21 = vpop.f32.mrf.mxu3 }
 0x1e9   : > { %v578_v22 = vadd.f32 %v577_v21, %v437_v18  ;;  %v553_v23 = vpop.f32.mrf.mxu1 }
 0x1ea   : > { %v599_v24 = vmax.f32 %v565_v20, 0.0  ;;  %v592_v25 = vpop.f32.mrf.mxu0 }
 0x1eb   : > { %v600_v26 = vmax.f32 %v578_v22, 0.0 }
 0x1ec   : > { %607 = vst [vmem:[%s1270_s5 + $0x28] sm:$0xff] %v599_v24 }
 0x1ed   : > { %608 = vst [vmem:[%s1270_s5 + $0x30] sm:$0xff] %v600_v26 }
 0x1ee   : > { %989 = shalt.err (!%p986_p5)
}
 0x1ef   : > { %807 = dma.vmem_to_hbm [thread:$0]  (%p1164_p11), %s625_s29, 1024, %s627_s14, %s611_s17   ;;  %v566_v27 = vpop.f32.mrf.mxu2 }
 0x1f0   : > { %v579_v28 = vpop.f32.mrf.mxu3 }
 0x1f1 PF: > { %s638_s26 = sand.u32 1, %s1020_s24   ;;  %p1337_p7 = scmp.ge.s32.totalorder %s1032_s27, 2 }
 0x1f2   : > { %s639_s13 = scalar_lea.sflag [#allocation4], %s638_s26 }
 0x1f3   : > { %p821_p10 = pnand %p1337_p7, %p1168_p12 }
 0x1f5   : > { %p822_p13 = pneg %p821_p10 }
 0x1f7   : > { %1015 = dma.done.wait (%p822_p13), %s639_s13, 1024  }
 0x1f8   : > { %1017 = vsyncadd (%p822_p13), %s639_s13, 4294966272  ;;  %s1338_s27 = sld [smem:[#allocation13_spill]]  ;;  %s1341_s24 = smov %s1024_s25 }
 0x1f9   : > { %s1339_s9 = sld [smem:[#allocation12_spill]] }
 0x1fa   : > { %s1340_s26 = sld [smem:[#allocation14_spill]] }
 0x1fe   : > { %p21_p11 = scmp.ge.s32.totalorder %s1338_s27, 4  }
 0x1ff   : > { %s1342_s25 = smov %s1339_s9 }
 0x200   :  { %23 = sbr.rel (!%p21_p11) target bundleno = 9 (0x9), region = 109 }
 0x205   :  { %645 = vsyncpa [#allocation3], 1 }
 0x206   :  { %647 = vsyncpa [#allocation3 + $0x1], 1 }
 0x207   :  { %648 = vsyncpa [#allocation6], 1 }
 0x208   :  { %650 = vsyncpa [#allocation6 + $0x1], 1 }
 0x209   :  { %651 = vsyncpa [#allocation4], 1 }
 0x20a   :  { %653 = vsyncpa [#allocation4 + $0x1], 1 }

</bundles_post_ra>
